<compile_context>
chip_gen: v7x
topology: tpu7x:2x2x1
jax: 0.10.0
libtpu: 0.0.40
codegen_flags: <defaults>
</compile_context>

<pallas_src>
import jax
import jax.numpy as jnp
from jax import lax
from jax.experimental import pallas as pl
from jax.experimental.pallas import tpu as pltpu


def lstm_last_pred_kernel(x_ref, wih_ref, whh_ref, b_ref, wlin_ref, blin_ref,
                          out_ref, xb_ref):
    """x:(T,I)  W_ih^T:(I,4Hp)  W_hh^T:(Hp,4Hp)  b:(1,4Hp)  W_lin:(O,Hp)
    b_lin:(O,1)  out:(O,1)  xb scratch:(T,4Hp).  Gate order (i,f,o,g), each
    gate padded to Hp=128*k lanes; padding lanes stay exactly zero."""
    T = x_ref.shape[0]
    Hp = whh_ref.shape[0]          # padded hidden width (multiple of 128)
    Gs = 3 * Hp                    # contiguous sigmoid region: i | f | o
    mm_dtype = whh_ref.dtype       # bf16 or f32 MXU operands

    # (1) Hoisted input projection + bias: no dependence on h, done once.
    if x_ref.shape[1] == 1:
        # I == 1: outer product == broadcast multiply (pure VPU, no MXU push).
        xb_ref[...] = x_ref[...] * wih_ref[...] + b_ref[...]
    else:
        xb_ref[...] = (jnp.dot(x_ref[...], wih_ref[...],
                               preferred_element_type=jnp.float32)
                       + b_ref[...])

    def step(t, carry):
        h, c = carry                                        # (1, Hp) f32 each
        # (6) bf16 operands, f32 accumulation; h/c carry stays f32.
        gates = xb_ref[pl.ds(t, 1), :] + jnp.dot(
            h.astype(mm_dtype), whh_ref[...],
            preferred_element_type=jnp.float32)             # (1, 4Hp)
        # (3)+(4) full-vreg gate blocks, bulk nonlinearities.
        sig = jax.nn.sigmoid(gates[:, :Gs])                 # i | f | o
        g_g = jnp.tanh(gates[:, Gs:])                       # g
        i_g = sig[:, 0 * Hp:1 * Hp]
        f_g = sig[:, 1 * Hp:2 * Hp]
        o_g = sig[:, 2 * Hp:3 * Hp]
        c_new = f_g * c + i_g * g_g
        h_new = o_g * jnp.tanh(c_new)
        return (h_new, c_new)

    h0 = jnp.zeros((1, Hp), jnp.float32)
    c0 = jnp.zeros((1, Hp), jnp.float32)
    # (2) fully unrolled serial recurrence (T static and small).
    h_T, _ = lax.fori_loop(0, T, step, (h0, c0), unroll=True)

    # (5) Linear head: VPU multiply + XLU lane reduce (padding lanes are zero).
    out_ref[...] = (jnp.sum(h_T * wlin_ref[...], axis=-1, keepdims=True)
                    + blin_ref[...])                        # (O, 1)


def lstm_model_forward(x, w_ih, w_hh, b_ih, b_hh, w_lin, b_lin,
                       *, recurrent_matmul_dtype=jnp.bfloat16):
    """x: (T,), (T, I) or (T, 1, I) float32.  Returns (output_size,) —
    i.e. predictions[-1] of the PyTorch module."""
    x = jnp.asarray(x, jnp.float32)
    if x.ndim == 1:
        x = x[:, None]                    # (T, I) with I=1
    elif x.ndim == 3:
        x = x.reshape(x.shape[0], -1)     # matches input_seq.view(T, 1, -1)
    T, I = x.shape
    H = w_hh.shape[1]
    O = w_lin.shape[0]
    Hp = ((H + 127) // 128) * 128         # pad each gate / h / c to full vregs

    # PyTorch gate order is (i, f, g, o); reorder to (i, f, o, g) so the three
    # sigmoid gates are one contiguous lane region and tanh(g) is the last.
    order = (0, 1, 3, 2)

    def pad_gate_cols(w_t):               # (rows, 4H) -> (rows, 4Hp), zero pad
        rows = w_t.shape[0]
        out = jnp.zeros((rows, 4 * Hp), jnp.float32)
        for n, p in enumerate(order):
            out = out.at[:, n * Hp:n * Hp + H].set(w_t[:, p * H:(p + 1) * H])
        return out

    wih_t = pad_gate_cols(jnp.transpose(w_ih).astype(jnp.float32))     # (I,4Hp)
    whh_t = jnp.zeros((Hp, 4 * Hp), jnp.float32)
    whh_t = whh_t.at[:H, :].set(
        pad_gate_cols(jnp.transpose(w_hh).astype(jnp.float32)))        # (Hp,4Hp)
    whh_t = whh_t.astype(recurrent_matmul_dtype)   # bf16 MXU operands (opt. 6)
    b = pad_gate_cols((b_ih + b_hh).astype(jnp.float32)[None, :])      # (1,4Hp)
    wlin_p = jnp.zeros((O, Hp), jnp.float32).at[:, :H].set(
        w_lin.astype(jnp.float32))                                     # (O,Hp)
    blin = b_lin.astype(jnp.float32)[:, None]                          # (O,1)

    vmem = pl.BlockSpec(memory_space=pltpu.MemorySpace.VMEM)
    out = pl.pallas_call(
        lstm_last_pred_kernel,
        out_shape=jax.ShapeDtypeStruct((O, 1), jnp.float32),
        in_specs=[vmem] * 6,
        out_specs=vmem,
        scratch_shapes=[pltpu.VMEM((T, 4 * Hp), jnp.float32)],  # hoisted x-proj
    )(x, wih_t, whh_t, b, wlin_p, blin)
    return out[:, 0]                                                   # (O,)


def _reference(x, w_ih, w_hh, b_ih, b_hh, w_lin, b_lin):
    """Pure-JAX f32 reference mirroring torch.nn.LSTM + Linear semantics."""
    x = jnp.asarray(x, jnp.float32)
    if x.ndim == 1:
        x = x[:, None]
    H = w_hh.shape[1]
    h = jnp.zeros((H,), jnp.float32)
    c = jnp.zeros((H,), jnp.float32)
    for t in range(x.shape[0]):
        gates = w_ih @ x[t] + b_ih + w_hh @ h + b_hh
        i = jax.nn.sigmoid(gates[0 * H:1 * H])
        f = jax.nn.sigmoid(gates[1 * H:2 * H])
        g = jnp.tanh(gates[2 * H:3 * H])
        o = jax.nn.sigmoid(gates[3 * H:4 * H])
        c = f * c + i * g
        h = o * jnp.tanh(c)
    return w_lin @ h + b_lin


if __name__ == "__main__":
    # Small shapes consistent with the module: input_size=1, hidden=32, out=1.
    T, I, H, O = 8, 1, 32, 1
    key = jax.random.PRNGKey(0)
    k = jax.random.split(key, 7)
    bound = 1.0 / (H ** 0.5)

    x = jax.random.normal(k[0], (T,), jnp.float32)
    w_ih = jax.random.uniform(k[1], (4 * H, I), jnp.float32, -bound, bound)
    w_hh = jax.random.uniform(k[2], (4 * H, H), jnp.float32, -bound, bound)
    b_ih = jax.random.uniform(k[3], (4 * H,), jnp.float32, -bound, bound)
    b_hh = jax.random.uniform(k[4], (4 * H,), jnp.float32, -bound, bound)
    w_lin = jax.random.uniform(k[5], (O, H), jnp.float32, -bound, bound)
    b_lin = jax.random.uniform(k[6], (O,), jnp.float32, -bound, bound)

    ref = _reference(x, w_ih, w_hh, b_ih, b_hh, w_lin, b_lin)

    # f32 MXU-operand path: must match the f32 reference tightly.
    pred_f32 = lstm_model_forward(x, w_ih, w_hh, b_ih, b_hh, w_lin, b_lin,
                                  recurrent_matmul_dtype=jnp.float32)
    pred_f32 = jax.block_until_ready(pred_f32)
    assert pred_f32.shape == (O,), pred_f32.shape
    assert jnp.allclose(pred_f32, ref, atol=1e-5, rtol=1e-5), (pred_f32, ref)

    # Default bf16-recurrent-matmul path (f32 accumulate + f32 h/c carry):
    # small, bounded drift vs the f32 reference.
    pred_bf16 = lstm_model_forward(x, w_ih, w_hh, b_ih, b_hh, w_lin, b_lin)
    pred_bf16 = jax.block_until_ready(pred_bf16)
    assert pred_bf16.shape == (O,), pred_bf16.shape
    assert jnp.allclose(pred_bf16, ref, atol=2e-2, rtol=2e-2), (pred_bf16, ref)

    print("KERNEL_OK")
</pallas_src>

<mosaic_0001>
module attributes {stable_mosaic.version = 11 : i64} {
  func.func @lstm_last_pred_kernel(%arg0: memref<8x1xf32, #tpu.memory_space<vmem>>, %arg1: memref<1x512xf32, #tpu.memory_space<vmem>>, %arg2: memref<128x512xf32, #tpu.memory_space<vmem>>, %arg3: memref<1x512xf32, #tpu.memory_space<vmem>>, %arg4: memref<1x128xf32, #tpu.memory_space<vmem>>, %arg5: memref<1x1xf32, #tpu.memory_space<vmem>>, %arg6: memref<1x1xf32, #tpu.memory_space<vmem>>, %arg7: memref<8x512xf32, #tpu.memory_space<vmem>>) attributes {dimension_semantics = [], scalar_prefetch = 0 : i64, scratch_operands = 1 : i64, tpu.core_type = #tpu.core_type<tc>} {
    %c0 = arith.constant 0 : index
    %c0_0 = arith.constant 0 : index
    %0 = vector.load %arg0[%c0, %c0_0] : memref<8x1xf32, #tpu.memory_space<vmem>>, vector<8x1xf32>
    %c0_1 = arith.constant 0 : index
    %c0_2 = arith.constant 0 : index
    %1 = vector.load %arg1[%c0_1, %c0_2] : memref<1x512xf32, #tpu.memory_space<vmem>>, vector<1x512xf32>
    %2 = vector.broadcast %0 : vector<8x1xf32> to vector<8x512xf32>
    %3 = vector.broadcast %1 : vector<1x512xf32> to vector<8x512xf32>
    %4 = arith.mulf %2, %3 : vector<8x512xf32>
    %c0_3 = arith.constant 0 : index
    %c0_4 = arith.constant 0 : index
    %5 = vector.load %arg3[%c0_3, %c0_4] : memref<1x512xf32, #tpu.memory_space<vmem>>, vector<1x512xf32>
    %6 = vector.broadcast %5 : vector<1x512xf32> to vector<8x512xf32>
    %7 = arith.addf %4, %6 : vector<8x512xf32>
    %c0_5 = arith.constant 0 : index
    %c0_6 = arith.constant 0 : index
    %8 = vector.load %arg7[%c0_5, %c0_6] : memref<8x512xf32, #tpu.memory_space<vmem>>, vector<8x512xf32>
    tpu.vector_store %arg7[%c0_5, %c0_6], %7 {strides = array<i32>} : memref<8x512xf32, #tpu.memory_space<vmem>>, vector<8x512xf32>,
    %cst = arith.constant 0.000000e+00 : f32
    %9 = vector.broadcast %cst : f32 to vector<1x128xf32>
    %cst_7 = arith.constant 0.000000e+00 : f32
    %10 = vector.broadcast %cst_7 : f32 to vector<1x128xf32>
    %c0_i32 = arith.constant 0 : i32
    %11 = arith.index_cast %c0_i32 : i32 to index
    %c0_8 = arith.constant 0 : index
    %12 = vector.load %arg7[%11, %c0_8] : memref<8x512xf32, #tpu.memory_space<vmem>>, vector<1x512xf32>
    %c0_9 = arith.constant 0 : index
    %c0_10 = arith.constant 0 : index
    %13 = vector.load %arg2[%c0_9, %c0_10] : memref<128x512xf32, #tpu.memory_space<vmem>>, vector<128x512xf32>
    %cst_11 = arith.constant dense<0.000000e+00> : vector<1x512xf32>
    %14 = tpu.matmul %9, %13, %cst_11 {dimension_numbers = #tpu.dot_dimension_numbers<[1], [0], [0], [1], [0, 0, 1, 1], [], []>} : vector<1x128xf32>, vector<128x512xf32>, vector<1x512xf32> -> vector<1x512xf32>
    %15 = arith.addf %12, %14 : vector<1x512xf32>
    %16 = vector.extract_strided_slice %15 {offsets = [0, 0], sizes = [1, 384], strides = [1, 1]} : vector<1x512xf32> to vector<1x384xf32>
    %17 = arith.negf %16 : vector<1x384xf32>
    %18 = math.exp %17 : vector<1x384xf32>
    %cst_12 = arith.constant 1.000000e+00 : f32
    %19 = vector.broadcast %cst_12 : f32 to vector<1x384xf32>
    %20 = arith.addf %19, %18 : vector<1x384xf32>
    %21 = arith.divf %19, %20 : vector<1x384xf32>
    %22 = vector.extract_strided_slice %15 {offsets = [0, 384], sizes = [1, 128], strides = [1, 1]} : vector<1x512xf32> to vector<1x128xf32>
    %23 = math.tanh %22 : vector<1x128xf32>
    %24 = vector.extract_strided_slice %21 {offsets = [0, 0], sizes = [1, 128], strides = [1, 1]} : vector<1x384xf32> to vector<1x128xf32>
    %25 = vector.extract_strided_slice %21 {offsets = [0, 128], sizes = [1, 128], strides = [1, 1]} : vector<1x384xf32> to vector<1x128xf32>
    %26 = vector.extract_strided_slice %21 {offsets = [0, 256], sizes = [1, 128], strides = [1, 1]} : vector<1x384xf32> to vector<1x128xf32>
    %27 = arith.mulf %25, %10 : vector<1x128xf32>
    %28 = arith.mulf %24, %23 : vector<1x128xf32>
    %29 = arith.addf %27, %28 : vector<1x128xf32>
    %30 = math.tanh %29 : vector<1x128xf32>
    %31 = arith.mulf %26, %30 : vector<1x128xf32>
    %c1_i32 = arith.constant 1 : i32
    %32 = arith.index_cast %c1_i32 : i32 to index
    %c0_13 = arith.constant 0 : index
    %33 = vector.load %arg7[%32, %c0_13] : memref<8x512xf32, #tpu.memory_space<vmem>>, vector<1x512xf32>
    %c0_14 = arith.constant 0 : index
    %c0_15 = arith.constant 0 : index
    %34 = vector.load %arg2[%c0_14, %c0_15] : memref<128x512xf32, #tpu.memory_space<vmem>>, vector<128x512xf32>
    %cst_16 = arith.constant dense<0.000000e+00> : vector<1x512xf32>
    %35 = tpu.matmul %31, %34, %cst_16 {dimension_numbers = #tpu.dot_dimension_numbers<[1], [0], [0], [1], [0, 0, 1, 1], [], []>} : vector<1x128xf32>, vector<128x512xf32>, vector<1x512xf32> -> vector<1x512xf32>
    %36 = arith.addf %33, %35 : vector<1x512xf32>
    %37 = vector.extract_strided_slice %36 {offsets = [0, 0], sizes = [1, 384], strides = [1, 1]} : vector<1x512xf32> to vector<1x384xf32>
    %38 = arith.negf %37 : vector<1x384xf32>
    %39 = math.exp %38 : vector<1x384xf32>
    %cst_17 = arith.constant 1.000000e+00 : f32
    %40 = vector.broadcast %cst_17 : f32 to vector<1x384xf32>
    %41 = arith.addf %40, %39 : vector<1x384xf32>
    %42 = arith.divf %40, %41 : vector<1x384xf32>
    %43 = vector.extract_strided_slice %36 {offsets = [0, 384], sizes = [1, 128], strides = [1, 1]} : vector<1x512xf32> to vector<1x128xf32>
    %44 = math.tanh %43 : vector<1x128xf32>
    %45 = vector.extract_strided_slice %42 {offsets = [0, 0], sizes = [1, 128], strides = [1, 1]} : vector<1x384xf32> to vector<1x128xf32>
    %46 = vector.extract_strided_slice %42 {offsets = [0, 128], sizes = [1, 128], strides = [1, 1]} : vector<1x384xf32> to vector<1x128xf32>
    %47 = vector.extract_strided_slice %42 {offsets = [0, 256], sizes = [1, 128], strides = [1, 1]} : vector<1x384xf32> to vector<1x128xf32>
    %48 = arith.mulf %46, %29 : vector<1x128xf32>
    %49 = arith.mulf %45, %44 : vector<1x128xf32>
    %50 = arith.addf %48, %49 : vector<1x128xf32>
    %51 = math.tanh %50 : vector<1x128xf32>
    %52 = arith.mulf %47, %51 : vector<1x128xf32>
    %c2_i32 = arith.constant 2 : i32
    %53 = arith.index_cast %c2_i32 : i32 to index
    %c0_18 = arith.constant 0 : index
    %54 = vector.load %arg7[%53, %c0_18] : memref<8x512xf32, #tpu.memory_space<vmem>>, vector<1x512xf32>
    %c0_19 = arith.constant 0 : index
    %c0_20 = arith.constant 0 : index
    %55 = vector.load %arg2[%c0_19, %c0_20] : memref<128x512xf32, #tpu.memory_space<vmem>>, vector<128x512xf32>
    %cst_21 = arith.constant dense<0.000000e+00> : vector<1x512xf32>
    %56 = tpu.matmul %52, %55, %cst_21 {dimension_numbers = #tpu.dot_dimension_numbers<[1], [0], [0], [1], [0, 0, 1, 1], [], []>} : vector<1x128xf32>, vector<128x512xf32>, vector<1x512xf32> -> vector<1x512xf32>
    %57 = arith.addf %54, %56 : vector<1x512xf32>
    %58 = vector.extract_strided_slice %57 {offsets = [0, 0], sizes = [1, 384], strides = [1, 1]} : vector<1x512xf32> to vector<1x384xf32>
    %59 = arith.negf %58 : vector<1x384xf32>
    %60 = math.exp %59 : vector<1x384xf32>
    %cst_22 = arith.constant 1.000000e+00 : f32
    %61 = vector.broadcast %cst_22 : f32 to vector<1x384xf32>
    %62 = arith.addf %61, %60 : vector<1x384xf32>
    %63 = arith.divf %61, %62 : vector<1x384xf32>
    %64 = vector.extract_strided_slice %57 {offsets = [0, 384], sizes = [1, 128], strides = [1, 1]} : vector<1x512xf32> to vector<1x128xf32>
    %65 = math.tanh %64 : vector<1x128xf32>
    %66 = vector.extract_strided_slice %63 {offsets = [0, 0], sizes = [1, 128], strides = [1, 1]} : vector<1x384xf32> to vector<1x128xf32>
    %67 = vector.extract_strided_slice %63 {offsets = [0, 128], sizes = [1, 128], strides = [1, 1]} : vector<1x384xf32> to vector<1x128xf32>
    %68 = vector.extract_strided_slice %63 {offsets = [0, 256], sizes = [1, 128], strides = [1, 1]} : vector<1x384xf32> to vector<1x128xf32>
    %69 = arith.mulf %67, %50 : vector<1x128xf32>
    %70 = arith.mulf %66, %65 : vector<1x128xf32>
    %71 = arith.addf %69, %70 : vector<1x128xf32>
    %72 = math.tanh %71 : vector<1x128xf32>
    %73 = arith.mulf %68, %72 : vector<1x128xf32>
    %c3_i32 = arith.constant 3 : i32
    %74 = arith.index_cast %c3_i32 : i32 to index
    %c0_23 = arith.constant 0 : index
    %75 = vector.load %arg7[%74, %c0_23] : memref<8x512xf32, #tpu.memory_space<vmem>>, vector<1x512xf32>
    %c0_24 = arith.constant 0 : index
    %c0_25 = arith.constant 0 : index
    %76 = vector.load %arg2[%c0_24, %c0_25] : memref<128x512xf32, #tpu.memory_space<vmem>>, vector<128x512xf32>
    %cst_26 = arith.constant dense<0.000000e+00> : vector<1x512xf32>
    %77 = tpu.matmul %73, %76, %cst_26 {dimension_numbers = #tpu.dot_dimension_numbers<[1], [0], [0], [1], [0, 0, 1, 1], [], []>} : vector<1x128xf32>, vector<128x512xf32>, vector<1x512xf32> -> vector<1x512xf32>
    %78 = arith.addf %75, %77 : vector<1x512xf32>
    %79 = vector.extract_strided_slice %78 {offsets = [0, 0], sizes = [1, 384], strides = [1, 1]} : vector<1x512xf32> to vector<1x384xf32>
    %80 = arith.negf %79 : vector<1x384xf32>
    %81 = math.exp %80 : vector<1x384xf32>
    %cst_27 = arith.constant 1.000000e+00 : f32
    %82 = vector.broadcast %cst_27 : f32 to vector<1x384xf32>
    %83 = arith.addf %82, %81 : vector<1x384xf32>
    %84 = arith.divf %82, %83 : vector<1x384xf32>
    %85 = vector.extract_strided_slice %78 {offsets = [0, 384], sizes = [1, 128], strides = [1, 1]} : vector<1x512xf32> to vector<1x128xf32>
    %86 = math.tanh %85 : vector<1x128xf32>
    %87 = vector.extract_strided_slice %84 {offsets = [0, 0], sizes = [1, 128], strides = [1, 1]} : vector<1x384xf32> to vector<1x128xf32>
    %88 = vector.extract_strided_slice %84 {offsets = [0, 128], sizes = [1, 128], strides = [1, 1]} : vector<1x384xf32> to vector<1x128xf32>
    %89 = vector.extract_strided_slice %84 {offsets = [0, 256], sizes = [1, 128], strides = [1, 1]} : vector<1x384xf32> to vector<1x128xf32>
    %90 = arith.mulf %88, %71 : vector<1x128xf32>
    %91 = arith.mulf %87, %86 : vector<1x128xf32>
    %92 = arith.addf %90, %91 : vector<1x128xf32>
    %93 = math.tanh %92 : vector<1x128xf32>
    %94 = arith.mulf %89, %93 : vector<1x128xf32>
    %c4_i32 = arith.constant 4 : i32
    %95 = arith.index_cast %c4_i32 : i32 to index
    %c0_28 = arith.constant 0 : index
    %96 = vector.load %arg7[%95, %c0_28] : memref<8x512xf32, #tpu.memory_space<vmem>>, vector<1x512xf32>
    %c0_29 = arith.constant 0 : index
    %c0_30 = arith.constant 0 : index
    %97 = vector.load %arg2[%c0_29, %c0_30] : memref<128x512xf32, #tpu.memory_space<vmem>>, vector<128x512xf32>
    %cst_31 = arith.constant dense<0.000000e+00> : vector<1x512xf32>
    %98 = tpu.matmul %94, %97, %cst_31 {dimension_numbers = #tpu.dot_dimension_numbers<[1], [0], [0], [1], [0, 0, 1, 1], [], []>} : vector<1x128xf32>, vector<128x512xf32>, vector<1x512xf32> -> vector<1x512xf32>
    %99 = arith.addf %96, %98 : vector<1x512xf32>
    %100 = vector.extract_strided_slice %99 {offsets = [0, 0], sizes = [1, 384], strides = [1, 1]} : vector<1x512xf32> to vector<1x384xf32>
    %101 = arith.negf %100 : vector<1x384xf32>
    %102 = math.exp %101 : vector<1x384xf32>
    %cst_32 = arith.constant 1.000000e+00 : f32
    %103 = vector.broadcast %cst_32 : f32 to vector<1x384xf32>
    %104 = arith.addf %103, %102 : vector<1x384xf32>
    %105 = arith.divf %103, %104 : vector<1x384xf32>
    %106 = vector.extract_strided_slice %99 {offsets = [0, 384], sizes = [1, 128], strides = [1, 1]} : vector<1x512xf32> to vector<1x128xf32>
    %107 = math.tanh %106 : vector<1x128xf32>
    %108 = vector.extract_strided_slice %105 {offsets = [0, 0], sizes = [1, 128], strides = [1, 1]} : vector<1x384xf32> to vector<1x128xf32>
    %109 = vector.extract_strided_slice %105 {offsets = [0, 128], sizes = [1, 128], strides = [1, 1]} : vector<1x384xf32> to vector<1x128xf32>
    %110 = vector.extract_strided_slice %105 {offsets = [0, 256], sizes = [1, 128], strides = [1, 1]} : vector<1x384xf32> to vector<1x128xf32>
    %111 = arith.mulf %109, %92 : vector<1x128xf32>
    %112 = arith.mulf %108, %107 : vector<1x128xf32>
    %113 = arith.addf %111, %112 : vector<1x128xf32>
    %114 = math.tanh %113 : vector<1x128xf32>
    %115 = arith.mulf %110, %114 : vector<1x128xf32>
    %c5_i32 = arith.constant 5 : i32
    %116 = arith.index_cast %c5_i32 : i32 to index
    %c0_33 = arith.constant 0 : index
    %117 = vector.load %arg7[%116, %c0_33] : memref<8x512xf32, #tpu.memory_space<vmem>>, vector<1x512xf32>
    %c0_34 = arith.constant 0 : index
    %c0_35 = arith.constant 0 : index
    %118 = vector.load %arg2[%c0_34, %c0_35] : memref<128x512xf32, #tpu.memory_space<vmem>>, vector<128x512xf32>
    %cst_36 = arith.constant dense<0.000000e+00> : vector<1x512xf32>
    %119 = tpu.matmul %115, %118, %cst_36 {dimension_numbers = #tpu.dot_dimension_numbers<[1], [0], [0], [1], [0, 0, 1, 1], [], []>} : vector<1x128xf32>, vector<128x512xf32>, vector<1x512xf32> -> vector<1x512xf32>
    %120 = arith.addf %117, %119 : vector<1x512xf32>
    %121 = vector.extract_strided_slice %120 {offsets = [0, 0], sizes = [1, 384], strides = [1, 1]} : vector<1x512xf32> to vector<1x384xf32>
    %122 = arith.negf %121 : vector<1x384xf32>
    %123 = math.exp %122 : vector<1x384xf32>
    %cst_37 = arith.constant 1.000000e+00 : f32
    %124 = vector.broadcast %cst_37 : f32 to vector<1x384xf32>
    %125 = arith.addf %124, %123 : vector<1x384xf32>
    %126 = arith.divf %124, %125 : vector<1x384xf32>
    %127 = vector.extract_strided_slice %120 {offsets = [0, 384], sizes = [1, 128], strides = [1, 1]} : vector<1x512xf32> to vector<1x128xf32>
    %128 = math.tanh %127 : vector<1x128xf32>
    %129 = vector.extract_strided_slice %126 {offsets = [0, 0], sizes = [1, 128], strides = [1, 1]} : vector<1x384xf32> to vector<1x128xf32>
    %130 = vector.extract_strided_slice %126 {offsets = [0, 128], sizes = [1, 128], strides = [1, 1]} : vector<1x384xf32> to vector<1x128xf32>
    %131 = vector.extract_strided_slice %126 {offsets = [0, 256], sizes = [1, 128], strides = [1, 1]} : vector<1x384xf32> to vector<1x128xf32>
    %132 = arith.mulf %130, %113 : vector<1x128xf32>
    %133 = arith.mulf %129, %128 : vector<1x128xf32>
    %134 = arith.addf %132, %133 : vector<1x128xf32>
    %135 = math.tanh %134 : vector<1x128xf32>
    %136 = arith.mulf %131, %135 : vector<1x128xf32>
    %c6_i32 = arith.constant 6 : i32
    %137 = arith.index_cast %c6_i32 : i32 to index
    %c0_38 = arith.constant 0 : index
    %138 = vector.load %arg7[%137, %c0_38] : memref<8x512xf32, #tpu.memory_space<vmem>>, vector<1x512xf32>
    %c0_39 = arith.constant 0 : index
    %c0_40 = arith.constant 0 : index
    %139 = vector.load %arg2[%c0_39, %c0_40] : memref<128x512xf32, #tpu.memory_space<vmem>>, vector<128x512xf32>
    %cst_41 = arith.constant dense<0.000000e+00> : vector<1x512xf32>
    %140 = tpu.matmul %136, %139, %cst_41 {dimension_numbers = #tpu.dot_dimension_numbers<[1], [0], [0], [1], [0, 0, 1, 1], [], []>} : vector<1x128xf32>, vector<128x512xf32>, vector<1x512xf32> -> vector<1x512xf32>
    %141 = arith.addf %138, %140 : vector<1x512xf32>
    %142 = vector.extract_strided_slice %141 {offsets = [0, 0], sizes = [1, 384], strides = [1, 1]} : vector<1x512xf32> to vector<1x384xf32>
    %143 = arith.negf %142 : vector<1x384xf32>
    %144 = math.exp %143 : vector<1x384xf32>
    %cst_42 = arith.constant 1.000000e+00 : f32
    %145 = vector.broadcast %cst_42 : f32 to vector<1x384xf32>
    %146 = arith.addf %145, %144 : vector<1x384xf32>
    %147 = arith.divf %145, %146 : vector<1x384xf32>
    %148 = vector.extract_strided_slice %141 {offsets = [0, 384], sizes = [1, 128], strides = [1, 1]} : vector<1x512xf32> to vector<1x128xf32>
    %149 = math.tanh %148 : vector<1x128xf32>
    %150 = vector.extract_strided_slice %147 {offsets = [0, 0], sizes = [1, 128], strides = [1, 1]} : vector<1x384xf32> to vector<1x128xf32>
    %151 = vector.extract_strided_slice %147 {offsets = [0, 128], sizes = [1, 128], strides = [1, 1]} : vector<1x384xf32> to vector<1x128xf32>
    %152 = vector.extract_strided_slice %147 {offsets = [0, 256], sizes = [1, 128], strides = [1, 1]} : vector<1x384xf32> to vector<1x128xf32>
    %153 = arith.mulf %151, %134 : vector<1x128xf32>
    %154 = arith.mulf %150, %149 : vector<1x128xf32>
    %155 = arith.addf %153, %154 : vector<1x128xf32>
    %156 = math.tanh %155 : vector<1x128xf32>
    %157 = arith.mulf %152, %156 : vector<1x128xf32>
    %c7_i32 = arith.constant 7 : i32
    %158 = arith.index_cast %c7_i32 : i32 to index
    %c0_43 = arith.constant 0 : index
    %159 = vector.load %arg7[%158, %c0_43] : memref<8x512xf32, #tpu.memory_space<vmem>>, vector<1x512xf32>
    %c0_44 = arith.constant 0 : index
    %c0_45 = arith.constant 0 : index
    %160 = vector.load %arg2[%c0_44, %c0_45] : memref<128x512xf32, #tpu.memory_space<vmem>>, vector<128x512xf32>
    %cst_46 = arith.constant dense<0.000000e+00> : vector<1x512xf32>
    %161 = tpu.matmul %157, %160, %cst_46 {dimension_numbers = #tpu.dot_dimension_numbers<[1], [0], [0], [1], [0, 0, 1, 1], [], []>} : vector<1x128xf32>, vector<128x512xf32>, vector<1x512xf32> -> vector<1x512xf32>
    %162 = arith.addf %159, %161 : vector<1x512xf32>
    %163 = vector.extract_strided_slice %162 {offsets = [0, 0], sizes = [1, 384], strides = [1, 1]} : vector<1x512xf32> to vector<1x384xf32>
    %164 = arith.negf %163 : vector<1x384xf32>
    %165 = math.exp %164 : vector<1x384xf32>
    %cst_47 = arith.constant 1.000000e+00 : f32
    %166 = vector.broadcast %cst_47 : f32 to vector<1x384xf32>
    %167 = arith.addf %166, %165 : vector<1x384xf32>
    %168 = arith.divf %166, %167 : vector<1x384xf32>
    %169 = vector.extract_strided_slice %162 {offsets = [0, 384], sizes = [1, 128], strides = [1, 1]} : vector<1x512xf32> to vector<1x128xf32>
    %170 = math.tanh %169 : vector<1x128xf32>
    %171 = vector.extract_strided_slice %168 {offsets = [0, 0], sizes = [1, 128], strides = [1, 1]} : vector<1x384xf32> to vector<1x128xf32>
    %172 = vector.extract_strided_slice %168 {offsets = [0, 128], sizes = [1, 128], strides = [1, 1]} : vector<1x384xf32> to vector<1x128xf32>
    %173 = vector.extract_strided_slice %168 {offsets = [0, 256], sizes = [1, 128], strides = [1, 1]} : vector<1x384xf32> to vector<1x128xf32>
    %174 = arith.mulf %172, %155 : vector<1x128xf32>
    %175 = arith.mulf %171, %170 : vector<1x128xf32>
    %176 = arith.addf %174, %175 : vector<1x128xf32>
    %177 = math.tanh %176 : vector<1x128xf32>
    %178 = arith.mulf %173, %177 : vector<1x128xf32>
    %c8_i32 = arith.constant 8 : i32
    %c0_48 = arith.constant 0 : index
    %c0_49 = arith.constant 0 : index
    %179 = vector.load %arg4[%c0_48, %c0_49] : memref<1x128xf32, #tpu.memory_space<vmem>>, vector<1x128xf32>
    %180 = arith.mulf %178, %179 : vector<1x128xf32>
    %cst_50 = arith.constant dense<0.000000e+00> : vector<1xf32>
    %181 = vector.multi_reduction <add>, %180, %cst_50 [1] : vector<1x128xf32> to vector<1xf32>
    %182 = vector.shape_cast %181 : vector<1xf32> to vector<1x1xf32>
    %c0_51 = arith.constant 0 : index
    %c0_52 = arith.constant 0 : index
    %183 = vector.load %arg5[%c0_51, %c0_52] : memref<1x1xf32, #tpu.memory_space<vmem>>, vector<1x1xf32>
    %184 = arith.addf %182, %183 : vector<1x1xf32>
    %c0_53 = arith.constant 0 : index
    %c0_54 = arith.constant 0 : index
    %185 = vector.load %arg6[%c0_53, %c0_54] : memref<1x1xf32, #tpu.memory_space<vmem>>, vector<1x1xf32>
    tpu.vector_store %arg6[%c0_53, %c0_54], %184 {strides = array<i32>} : memref<1x1xf32, #tpu.memory_space<vmem>>, vector<1x1xf32>,
    return
  }
}

</mosaic_0001>

<bundles_post_ra>
// kernel: tpu_custom_call.1
= control target key start
LH: loop header
LB: loop body
LE: loop exit
PB: predicated region body
PF: predicated region fallthrough
CT: control target
= control target key end

     0   :  { %s2847_s0 = inlined_call_operand.vmem [shape: f32[8,1], index: 0, kind: input, shape index: {}]   ;;  %s2848_s1 = inlined_call_operand.vmem [shape: f32[1,512], index: 1, kind: input, shape index: {}]   ;;  %s2849_s2 = inlined_call_operand.hbm [shape: f32[128,512], index: 2, kind: input, shape index: {}]   ;;  %s2850_s3 = inlined_call_operand.vmem [shape: f32[1,512], index: 3, kind: input, shape index: {}]   ;;  %s2851_s4 = inlined_call_operand.vmem [shape: f32[1,128], index: 4, kind: input, shape index: {}]   ;;  %s2852_s5 = inlined_call_operand.<no memory space> [shape: f32[1,1], index: 5, kind: input, shape index: {}]   ;;  %s2853_s6 = inlined_call_operand.hbm [shape: f32[1,1], index: 6, kind: output, shape index: {}]  }
   0x1   :  { %v11_v0 = vstv %s2852_s5 }
   0x2   :  { %12 = vst [vmem:[#allocation3] sm:$0x1] %v11_v0 }
   0x3   :  { %13 = vsyncpa [#allocation5], 0 }
   0x4   :  { %14 = vsyncpa [#allocation6], 0  ;;  %s2382_s23 = smov [#allocation4]   ;;  %s2334_s27 = scalar_lea.hbm %s2849_s2, 8192 }
   0x5   :  { %s24_s24 = sshll.u32 %s2382_s23, 4  ;;  %p2335_p0 = scmp.ne.s32.totalorder %s2849_s2, %s2334_s27  ;;  %s25_s24 = int_to_ptr.vmem [resolvable:$true] %s24_s24 }
   0x6   :  { %p2338_p1 = scmp.lt.u32.totalorder %s2334_s27, %s2849_s2 }
   0x8   :  { %p2340_p2 = pnand %p2338_p1, %p2335_p0 }
   0xa   :  { %2343 = shalt.err (!%p2340_p2)
}
   0xb   :  { %s2344_s5 = scalar_lea.vmem %s25_s24, 8192  ;;  %p2349_p4 = scmp.lt.s32.totalorder %s25_s24, %s25_s24 }
   0xc   :  { %p2345_p3 = scmp.ne.s32.totalorder %s25_s24, %s2344_s5  ;;  %p2350_p5 = scmp.lt.s32.totalorder %s2344_s5, %s2344_s5 }
   0xe   :  { %p2351_p6 = por %p2350_p5, %p2349_p4 }
  0x10   :  { %p2352_p7 = pnand %p2351_p6, %p2345_p3 }
  0x12   :  { %2355 = shalt.err (!%p2352_p7)
}
  0x13   :  { %s2383_s8 = smov 512   ;;  %s2384_s9 = smov 32  }
  0x14   :  { %30 = dma.hbm_to_vmem [thread:$0]  %s2849_s2, 8192, %s25_s24, [#allocation5], %s2383_s8, %s2383_s8, %s2384_s9  }
  0x15   :  { %2378 = dma.done.wait [#allocation5], 8192  }
  0x16   :  { %2379 = vsyncadd [#allocation5], 4294959104  ;;  %v2385_v1 = vmov 0.0   ;;  %v2386_v2 = vmov 0   ;;  %v104_v3 = vld [vmem:[#allocation4 + $0x8] sm:$0xff]  ;;  %v106_v5 = vld [vmem:[#allocation4 + $0x18] sm:$0xff] }
  0x17   :  { %231 = vmatprep.mubr.f32.mxu0 %v2385_v1  ;;  %302 = vmatprep.mubr.f32.mxu1 %v2385_v1  ;;  %v108_v4 = vld [vmem:[#allocation4 + $0x28] sm:$0xff]  ;;  %v110_v7 = vld [vmem:[#allocation4 + $0x38] sm:$0xff]  ;;  %v103_v8 = vld [vmem:[#allocation4] sm:$0xff]  ;;  %vm1719_vm0 = vcmask 1040384   ;;  %s2388_s16 = smov [#allocation7]   ;;  %vm1725_vm1 = vcmask 0  }
  0x18   :  { %2269 = vset.pattern.permute.xlu0 %v2386_v2  ;;  %v2441_v6 = vpack.c.bf16 %v108_v4, %v104_v3  ;;  %v107_v9 = vld [vmem:[#allocation4 + $0x20] sm:$0xff]  ;;  %v2443_v10 = vpack.c.bf16 %v110_v7, %v106_v5  ;;  %v105_v12 = vld [vmem:[#allocation4 + $0x10] sm:$0xff]  ;;  %v112_v14 = vld [vmem:[#allocation4 + $0x48] sm:$0xff]  ;;  %s1733_s17 = sshll.u32 %s2388_s16, 4  ;;  %s1734_s17 = int_to_ptr.vmem [resolvable:$true] %s1733_s17 }
  0x19   :  { %v2445_v11 = vpack.c.bf16 %v107_v9, %v103_v8  ;;  %v109_v13 = vld [vmem:[#allocation4 + $0x30] sm:$0xff]  ;;  %v116_v16 = vld [vmem:[#allocation4 + $0x68] sm:$0xff]  ;;  %v114_v17 = vld [vmem:[#allocation4 + $0x58] sm:$0xff]  ;;  %s2356_s18 = scalar_lea.vmem %s1734_s17, 16  ;;  %s2360_s19 = scalar_lea.vmem %s1734_s17, 32 }
  0x1a   :  { %1751 = vmatprep.subr.bf16.mxu0 %v2441_v6  ;;  %v2448_v15 = vpack.c.bf16 %v109_v13, %v105_v12  ;;  %v118_v18 = vld [vmem:[#allocation4 + $0x78] sm:$0xff]  ;;  %1783 = vmatprep.subr.bf16.mxu1 %v2443_v10  ;;  %v2452_v19 = vpack.c.bf16 %v116_v16, %v112_v14  ;;  %v111_v21 = vld [vmem:[#allocation4 + $0x40] sm:$0xff]  ;;  %v113_v23 = vld [vmem:[#allocation4 + $0x50] sm:$0xff]  ;;  %p2357_p8 = scmp.ne.s32.totalorder %s1734_s17, %s2356_s18  ;;  %p2361_p9 = scmp.lt.s32.totalorder %s1734_s17, %s1734_s17 }
  0x1b   :  { %1753 = vmatpush1.bf16.msra.mxu0 %v2445_v11  ;;  %v2454_v20 = vpack.c.bf16 %v118_v18, %v114_v17  ;;  %v115_v22 = vld [vmem:[#allocation4 + $0x60] sm:$0xff]  ;;  %v117_v25 = vld [vmem:[#allocation4 + $0x70] sm:$0xff]  ;;  %v120_v26 = vld [vmem:[#allocation4 + $0x88] sm:$0xff]  ;;  %p2362_p10 = scmp.lt.s32.totalorder %s2360_s19, %s2356_s18 }
  0x1c   :  { %1785 = vmatpush1.bf16.msra.mxu1 %v2448_v15  ;;  %v2457_v24 = vpack.c.bf16 %v115_v22, %v111_v21  ;;  %v124_v27 = vld [vmem:[#allocation4 + $0xa8] sm:$0xff]  ;;  %1755 = vmatprep.subr.bf16.mxu0 %v2452_v19  ;;  %v2461_v28 = vpack.c.bf16 %v117_v25, %v113_v23  ;;  %v122_v30 = vld [vmem:[#allocation4 + $0x98] sm:$0xff]  ;;  %v119_v32 = vld [vmem:[#allocation4 + $0x80] sm:$0xff] }
  0x1d   :  { %1787 = vmatprep.subr.bf16.mxu1 %v2454_v20  ;;  %v2463_v29 = vpack.c.bf16 %v124_v27, %v120_v26  ;;  %v126_v31 = vld [vmem:[#allocation4 + $0xb8] sm:$0xff]  ;;  %v123_v34 = vld [vmem:[#allocation4 + $0xa0] sm:$0xff]  ;;  %v121_v35 = vld [vmem:[#allocation4 + $0x90] sm:$0xff]  ;;  %p2363_p11 = por %p2362_p10, %p2361_p9 }
  0x1e   :  { %v2465_v33 = vpack.c.bf16 %v126_v31, %v122_v30  ;;  %v125_v36 = vld [vmem:[#allocation4 + $0xb0] sm:$0xff]  ;;  %v2468_v37 = vpack.c.bf16 %v123_v34, %v119_v32  ;;  %v128_v38 = vld [vmem:[#allocation4 + $0xc8] sm:$0xff]  ;;  %v130_v40 = vld [vmem:[#allocation4 + $0xd8] sm:$0xff] }
  0x1f   :  { %1757 = vmatpush1.bf16.msra.mxu0 %v2457_v24  ;;  %v132_v39 = vld [vmem:[#allocation4 + $0xe8] sm:$0xff]  ;;  %v2472_v41 = vpack.c.bf16 %v125_v36, %v121_v35  ;;  %v134_v43 = vld [vmem:[#allocation4 + $0xf8] sm:$0xff]  ;;  %v127_v44 = vld [vmem:[#allocation4 + $0xc0] sm:$0xff]  ;;  %p2364_p12 = pnand %p2363_p11, %p2357_p8 }
  0x20   :  { %1789 = vmatpush1.bf16.msra.mxu1 %v2461_v28  ;;  %1759 = vmatprep.subr.bf16.mxu0 %v2463_v29  ;;  %v2474_v42 = vpack.c.bf16 %v132_v39, %v128_v38  ;;  %v131_v45 = vld [vmem:[#allocation4 + $0xe0] sm:$0xff]  ;;  %v2477_v46 = vpack.c.bf16 %v134_v43, %v130_v40  ;;  %v129_v47 = vld [vmem:[#allocation4 + $0xd0] sm:$0xff]  ;;  %v136_v49 = vld [vmem:[#allocation4 + $0x108] sm:$0xff] }
  0x21   :  { %1791 = vmatprep.subr.bf16.mxu1 %v2465_v33  ;;  %v133_v48 = vld [vmem:[#allocation4 + $0xf0] sm:$0xff]  ;;  %v140_v50 = vld [vmem:[#allocation4 + $0x128] sm:$0xff]  ;;  %v138_v51 = vld [vmem:[#allocation4 + $0x118] sm:$0xff]  ;;  %v2480_v53 = vpack.c.bf16 %v131_v45, %v127_v44 }
  0x22   :  { %v142_v52 = vld [vmem:[#allocation4 + $0x138] sm:$0xff]  ;;  %v2484_v54 = vpack.c.bf16 %v133_v48, %v129_v47  ;;  %v2486_v55 = vpack.c.bf16 %v140_v50, %v136_v49  ;;  %v135_v56 = vld [vmem:[#allocation4 + $0x100] sm:$0xff]  ;;  %v137_v58 = vld [vmem:[#allocation4 + $0x110] sm:$0xff] }
  0x23   :  { %1761 = vmatpush1.bf16.msra.mxu0 %v2468_v37  ;;  %v139_v57 = vld [vmem:[#allocation4 + $0x120] sm:$0xff]  ;;  %v2489_v59 = vpack.c.bf16 %v142_v52, %v138_v51  ;;  %v141_v60 = vld [vmem:[#allocation4 + $0x130] sm:$0xff]  ;;  %v144_v61 = vld [vmem:[#allocation4 + $0x148] sm:$0xff]  ;;  %v48_v51 = vlaneseq }
  0x24   :  { %1793 = vmatpush1.bf16.msra.mxu1 %v2472_v41  ;;  %1763 = vmatprep.subr.bf16.mxu0 %v2474_v42  ;;  %v148_v62 = vld [vmem:[#allocation4 + $0x168] sm:$0xff]  ;;  %v146_v63 = vld [vmem:[#allocation4 + $0x158] sm:$0xff]  ;;  %v2492_v2 = vpack.c.bf16 %v139_v57, %v135_v56  ;;  %v2496_v3 = vpack.c.bf16 %v141_v60, %v137_v58  ;;  %v143_v5 = vld [vmem:[#allocation4 + $0x140] sm:$0xff] }
  0x25   :  { %1795 = vmatprep.subr.bf16.mxu1 %v2477_v46  ;;  %v150_v0 = vld [vmem:[#allocation4 + $0x178] sm:$0xff]  ;;  %v2498_v4 = vpack.c.bf16 %v148_v62, %v144_v61  ;;  %v147_v7 = vld [vmem:[#allocation4 + $0x160] sm:$0xff]  ;;  %v145_v8 = vld [vmem:[#allocation4 + $0x150] sm:$0xff]  ;;  %v49_v52 = vshrl.u32 %v48_v51, 7 }
  0x26   :  { %v2501_v9 = vpack.c.bf16 %v150_v0, %v146_v63  ;;  %v149_v12 = vld [vmem:[#allocation4 + $0x170] sm:$0xff]  ;;  %v152_v13 = vld [vmem:[#allocation4 + $0x188] sm:$0xff]  ;;  %v154_v16 = vld [vmem:[#allocation4 + $0x198] sm:$0xff]  ;;  %v2504_v18 = vpack.c.bf16 %v147_v7, %v143_v5 }
  0x27   :  { %1765 = vmatpush1.bf16.msra.mxu0 %v2480_v53  ;;  %v156_v14 = vld [vmem:[#allocation4 + $0x1a8] sm:$0xff]  ;;  %v158_v17 = vld [vmem:[#allocation4 + $0x1b8] sm:$0xff]  ;;  %v151_v21 = vld [vmem:[#allocation4 + $0x180] sm:$0xff]  ;;  %v2508_v22 = vpack.c.bf16 %v149_v12, %v145_v8  ;;  %v50_v56 = vsub.s32 0, %v49_v52  ;;  %v54_v57 = vsub.s32 1, %v49_v52  ;;  %v58_v58 = vsub.s32 2, %v49_v52 }
  0x28   :  { %1797 = vmatpush1.bf16.msra.mxu1 %v2484_v54  ;;  %1767 = vmatprep.subr.bf16.mxu0 %v2486_v55  ;;  %v2510_v23 = vpack.c.bf16 %v156_v14, %v152_v13  ;;  %v155_v25 = vld [vmem:[#allocation4 + $0x1a0] sm:$0xff]  ;;  %v153_v26 = vld [vmem:[#allocation4 + $0x190] sm:$0xff]  ;;  %v2516_v30 = vpack.c.bf16 %v158_v17, %v154_v16  ;;  %v160_v32 = vld [vmem:[#allocation4 + $0x1c8] sm:$0xff]  ;;  %v62_v60 = vsub.s32 3, %v49_v52 }
  0x29   :  { %1799 = vmatprep.subr.bf16.mxu1 %v2489_v59  ;;  %v40_v27 = vld [vmem:[%s2847_s0] sm:$0xff]  ;;  %v157_v31 = vld [vmem:[#allocation4 + $0x1b0] sm:$0xff]  ;;  %v164_v34 = vld [vmem:[#allocation4 + $0x1e8] sm:$0xff]  ;;  %v2519_v38 = vpack.c.bf16 %v155_v25, %v151_v21 }
  0x2a   :  { %44 = vperm.xlu0 %2269, %v40_v27   ;;  %v162_v35 = vld [vmem:[#allocation4 + $0x1d8] sm:$0xff]  ;;  %v2523_v39 = vpack.c.bf16 %v157_v31, %v153_v26  ;;  %v2525_v40 = vpack.c.bf16 %v164_v34, %v160_v32  ;;  %v159_v43 = vld [vmem:[#allocation4 + $0x1c0] sm:$0xff]  ;;  %v161_v47 = vld [vmem:[#allocation4 + $0x1d0] sm:$0xff] }
  0x2b   :  { %1769 = vmatpush1.bf16.msra.mxu0 %v2492_v2  ;;  %v166_v36 = vld [vmem:[#allocation4 + $0x1f8] sm:$0xff]  ;;  %v163_v44 = vld [vmem:[#allocation4 + $0x1e0] sm:$0xff]  ;;  %v165_v48 = vld [vmem:[#allocation4 + $0x1f0] sm:$0xff] }
  0x2c   :  { %1801 = vmatpush1.bf16.msra.mxu1 %v2496_v3  ;;  %1771 = vmatprep.subr.bf16.mxu0 %v2498_v4  ;;  %v2528_v45 = vpack.c.bf16 %v166_v36, %v162_v35  ;;  %v2531_v49 = vpack.c.bf16 %v163_v44, %v159_v43  ;;  %v2535_v50 = vpack.c.bf16 %v165_v48, %v161_v47  ;;  %v41_v61 = vld [vmem:[%s2848_s1] sm:$0xf]  ;;  %v2387_v35 = vmov 1966171168  }
  0x2d   :  { %1803 = vmatprep.subr.bf16.mxu1 %v2501_v9  ;;  %v72_v62 = vld [vmem:[%s2850_s3] sm:$0xf]  ;;  %v51_v63 = vrot.slane %v41_v61, %v50_v56  ;;  %v55_v0 = vrot.slane %v41_v61, %v54_v57  ;;  %v59_v5 = vrot.slane %v41_v61, %v58_v58  ;;  %v63_v7 = vrot.slane %v41_v61, %v62_v60 }
  0x2e   :  { %v77_v8 = vrot.slane %v72_v62, %v50_v56  ;;  %v81_v12 = vrot.slane %v72_v62, %v54_v57  ;;  %v85_v13 = vrot.slane %v72_v62, %v58_v58  ;;  %v89_v14 = vrot.slane %v72_v62, %v62_v60 }
  0x2f   :  { %1773 = vmatpush1.bf16.msra.mxu0 %v2504_v18  ;;  %v316_v36 = vunpack.c.l.s4 %v2387_v35 }
  0x30   :  { %1805 = vmatpush1.bf16.msra.mxu1 %v2508_v22  ;;  %1775 = vmatprep.subr.bf16.mxu0 %v2510_v23 }
  0x31   :  { %1807 = vmatprep.subr.bf16.mxu1 %v2516_v30  ;;  %v317_v43 = vunpack.c.0.s8 %v316_v36 }
  0x33   :  { %1777 = vmatpush1.bf16.msra.mxu0 %v2519_v38  ;;  %v2584_v44 = vsub.s32 %v317_v43, %v49_v52 }
  0x34   :  { %1809 = vmatpush1.bf16.msra.mxu1 %v2523_v39  ;;  %1779 = vmatprep.subr.bf16.mxu0 %v2525_v40 }
  0x35   :  { %1811 = vmatprep.subr.bf16.mxu1 %v2528_v45 }
  0x37   :  { %1781 = vmatpush1.bf16.msra.mxu0 %v2531_v49 }
  0x38   :  { %1813 = vmatpush1.bf16.msra.mxu1 %v2535_v50  ;;  %1815 = vmatprep.subr.bf16.mxu0 %v2441_v6 }
  0x39   :  { %1847 = vmatprep.subr.bf16.mxu1 %v2443_v10 }
  0x3a   :  { %232 = vmatmul.mubr.f32.vlgmr.msra.gmra.mrb[0].mxu0 %v2385_v1 }
  0x3b   :  { %303 = vmatmul.mubr.f32.vlgmr.msra.gmra.mrb[0].mxu1 %v2385_v1  ;;  %1817 = vmatpush1.bf16.msra.mxu0 %v2445_v11 }
  0x3c   :  { %1849 = vmatpush1.bf16.msra.mxu1 %v2448_v15  ;;  %1819 = vmatprep.subr.bf16.mxu0 %v2452_v19 }
  0x3d   :  { %1851 = vmatprep.subr.bf16.mxu1 %v2454_v20  ;;  %425 = vmatprep.mubr.f32.mxu0 %v2385_v1 }
  0x3e   :  { %496 = vmatprep.mubr.f32.mxu1 %v2385_v1 }
  0x3f   :  { %1821 = vmatpush1.bf16.msra.mxu0 %v2457_v24 }
  0x40   :  { %1853 = vmatpush1.bf16.msra.mxu1 %v2461_v28  ;;  %1823 = vmatprep.subr.bf16.mxu0 %v2463_v29 }
  0x41   :  { %1855 = vmatprep.subr.bf16.mxu1 %v2465_v33 }
  0x43   :  { %1825 = vmatpush1.bf16.msra.mxu0 %v2468_v37 }
  0x44   :  { %1857 = vmatpush1.bf16.msra.mxu1 %v2472_v41  ;;  %1827 = vmatprep.subr.bf16.mxu0 %v2474_v42 }
  0x45   :  { %1859 = vmatprep.subr.bf16.mxu1 %v2477_v46 }
  0x47   :  { %1829 = vmatpush1.bf16.msra.mxu0 %v2480_v53 }
  0x48   :  { %1861 = vmatpush1.bf16.msra.mxu1 %v2484_v54  ;;  %1831 = vmatprep.subr.bf16.mxu0 %v2486_v55 }
  0x49   :  { %1863 = vmatprep.subr.bf16.mxu1 %v2489_v59 }
  0x4b   :  { %1833 = vmatpush1.bf16.msra.mxu0 %v2492_v2 }
  0x4c   :  { %1865 = vmatpush1.bf16.msra.mxu1 %v2496_v3  ;;  %1835 = vmatprep.subr.bf16.mxu0 %v2498_v4 }
  0x4d   :  { %1867 = vmatprep.subr.bf16.mxu1 %v2501_v9 }
  0x4f   :  { %1837 = vmatpush1.bf16.msra.mxu0 %v2504_v18 }
  0x50   :  { %1869 = vmatpush1.bf16.msra.mxu1 %v2508_v22  ;;  %1839 = vmatprep.subr.bf16.mxu0 %v2510_v23 }
  0x51   :  { %1871 = vmatprep.subr.bf16.mxu1 %v2516_v30 }
  0x53   :  { %1841 = vmatpush1.bf16.msra.mxu0 %v2519_v38 }
  0x54   :  { %1873 = vmatpush1.bf16.msra.mxu1 %v2523_v39  ;;  %1843 = vmatprep.subr.bf16.mxu0 %v2525_v40 }
  0x55   :  { %1875 = vmatprep.subr.bf16.mxu1 %v2528_v45 }
  0x57   :  { %1845 = vmatpush1.bf16.msra.mxu0 %v2531_v49 }
  0x58   :  { %1877 = vmatpush1.bf16.msra.mxu1 %v2535_v50  ;;  %1879 = vmatprep.subr.bf16.mxu0 %v2441_v6 }
  0x59   :  { %1911 = vmatprep.subr.bf16.mxu1 %v2443_v10 }
  0xa9   :  { %v45_v16 = vpop.permute.xlu0 %44 }
  0xaa   :  { %v68_v17 = vmul.f32 %v51_v63, %v45_v16  ;;  %v69_v21 = vmul.f32 %v55_v0, %v45_v16  ;;  %v70_v25 = vmul.f32 %v59_v5, %v45_v16  ;;  %v71_v26 = vmul.f32 %v63_v7, %v45_v16 }
  0xac   :  { %v94_v27 = vadd.f32 %v77_v8, %v68_v17  ;;  %v95_v31 = vadd.f32 %v81_v12, %v69_v21  ;;  %v96_v32 = vadd.f32 %v85_v13, %v70_v25  ;;  %v97_v34 = vadd.f32 %v89_v14, %v71_v26 }
  0xae   :  { %98 = vst [vmem:[#allocation2] sm:$0xff] %v94_v27  ;;  %99 = vst [vmem:[#allocation2 + $0x8] sm:$0xff] %v95_v31 }
  0xaf   :  { %100 = vst [vmem:[#allocation2 + $0x10] sm:$0xff] %v96_v32  ;;  %101 = vst [vmem:[#allocation2 + $0x18] sm:$0xff] %v97_v34 }
  0xb6   :  { %v102_v63 = vld [vmem:[#allocation2] ss:$8 sm:$0xf] }
 0x10d   :  { %v233_v47 = vpop.f32.mrb[0].mxu0 }
 0x10e   :  { %v304_v48 = vpop.f32.mrb[0].mxu1  ;;  %v235_v51 = vpop.f32.mrb[1].mxu0 }
 0x10f   :  { %v313_v56 = vcombine.low %v233_v47, %v235_v51  ;;  %v306_v57 = vpop.f32.mrb[1].mxu1 }
 0x110   :  { %v314_v58 = vcombine.low %v304_v48, %v306_v57 }
 0x111   :  { %v321_v60 = vrot.slane %v313_v56, %v2584_v44 }
 0x112   :  { %v328_v61 = vrot.slane %v314_v58, %v2584_v44  ;;  %v360_v58 = vld [vmem:[#allocation2 + $0x1] ss:$8 sm:$0xf] }
 0x114   :  { %v329_v62 = vcombine.low %v321_v60, %v328_v61 }
 0x116   :  { %v336_v0 = vrot.slane %v329_v62, %v2584_v44 }
 0x118   :  { %v338_v5 = vadd.f32 %v336_v0, %v102_v63 }
 0x11a   :  { %v1742_v7 = vmul.f32 -1.442695, %v338_v5  ;;  %v346_v12 = vrot.slane %v338_v5, 3 }
 0x11c   :  { %2270 = vpow2.f32 %v1742_v7 }
 0x126   :  { %v2271_v8 = vpop.eup %2270 }
 0x127   :  { %v342_v52 = vadd.f32 1.0, %v2271_v8 }
 0x129   :  { %2272 = vrcp.f32 %v342_v52 }
 0x12a   :  { %2274 = vtanh.f32 %v346_v12 }
 0x133   :  { %v2273_v13 = vpop.eup %2272 }
 0x134   :  { %v350_v14 = vrot.slane %v2273_v13, 1  ;;  %v2275_v16 = vpop.eup %2274  ;;  %v356_v26 = vrot.slane %v2273_v13, 2 }
 0x135   :  { %v353_v17 = vmul.f32 %v2275_v16, %v2273_v13 }
 0x136   :  { %v352_v21 = vmul.f32 0.0, %v350_v14 }
 0x138   :  { %v2589_v25 = vadd.f32 %v353_v17, %v352_v21 }
 0x13a   :  { %2276 = vtanh.f32 %v2589_v25 }
 0x144   :  { %v2277_v27 = vpop.eup %2276 }
 0x145   :  { %v358_v31 = vmul.f32 %v2277_v27, %v356_v26 }
 0x147   :  { %426 = vmatmul.mubr.f32.vlgmr.msra.gmra.mrb[2].mxu0 %v358_v31  ;;  %497 = vmatmul.mubr.f32.vlgmr.msra.gmra.mrb[2].mxu1 %v358_v31 }
 0x148   :  { %1881 = vmatpush1.bf16.msra.mxu0 %v2445_v11  ;;  %1913 = vmatpush1.bf16.msra.mxu1 %v2448_v15 }
 0x149   :  { %1883 = vmatprep.subr.bf16.mxu0 %v2452_v19  ;;  %1915 = vmatprep.subr.bf16.mxu1 %v2454_v20 }
 0x14a   :  { %619 = vmatprep.mubr.f32.mxu0 %v2385_v1  ;;  %690 = vmatprep.mubr.f32.mxu1 %v2385_v1 }
 0x14c   :  { %1885 = vmatpush1.bf16.msra.mxu0 %v2457_v24  ;;  %1917 = vmatpush1.bf16.msra.mxu1 %v2461_v28 }
 0x14d   :  { %1887 = vmatprep.subr.bf16.mxu0 %v2463_v29  ;;  %1919 = vmatprep.subr.bf16.mxu1 %v2465_v33 }
 0x150   :  { %1889 = vmatpush1.bf16.msra.mxu0 %v2468_v37  ;;  %1921 = vmatpush1.bf16.msra.mxu1 %v2472_v41 }
 0x151   :  { %1891 = vmatprep.subr.bf16.mxu0 %v2474_v42  ;;  %1923 = vmatprep.subr.bf16.mxu1 %v2477_v46 }
 0x154   :  { %1893 = vmatpush1.bf16.msra.mxu0 %v2480_v53  ;;  %1925 = vmatpush1.bf16.msra.mxu1 %v2484_v54 }
 0x155   :  { %1895 = vmatprep.subr.bf16.mxu0 %v2486_v55  ;;  %1927 = vmatprep.subr.bf16.mxu1 %v2489_v59 }
 0x158   :  { %1897 = vmatpush1.bf16.msra.mxu0 %v2492_v2  ;;  %1929 = vmatpush1.bf16.msra.mxu1 %v2496_v3 }
 0x159   :  { %1899 = vmatprep.subr.bf16.mxu0 %v2498_v4  ;;  %1931 = vmatprep.subr.bf16.mxu1 %v2501_v9 }
 0x15c   :  { %1901 = vmatpush1.bf16.msra.mxu0 %v2504_v18  ;;  %1933 = vmatpush1.bf16.msra.mxu1 %v2508_v22 }
 0x15d   :  { %1903 = vmatprep.subr.bf16.mxu0 %v2510_v23  ;;  %1935 = vmatprep.subr.bf16.mxu1 %v2516_v30 }
 0x160   :  { %1905 = vmatpush1.bf16.msra.mxu0 %v2519_v38  ;;  %1937 = vmatpush1.bf16.msra.mxu1 %v2523_v39 }
 0x161   :  { %1907 = vmatprep.subr.bf16.mxu0 %v2525_v40  ;;  %1939 = vmatprep.subr.bf16.mxu1 %v2528_v45 }
 0x164   :  { %1909 = vmatpush1.bf16.msra.mxu0 %v2531_v49  ;;  %1941 = vmatpush1.bf16.msra.mxu1 %v2535_v50 }
 0x165   :  { %1943 = vmatprep.subr.bf16.mxu0 %v2441_v6  ;;  %1975 = vmatprep.subr.bf16.mxu1 %v2443_v10 }
 0x21a   :  { %v427_v32 = vpop.f32.mrb[2].mxu0  ;;  %v498_v34 = vpop.f32.mrb[2].mxu1 }
 0x21b   :  { %v429_v35 = vpop.f32.mrb[3].mxu0  ;;  %v500_v36 = vpop.f32.mrb[3].mxu1 }
 0x21c   :  { %v507_v43 = vcombine.low %v427_v32, %v429_v35  ;;  %v508_v47 = vcombine.low %v498_v34, %v500_v36 }
 0x21e   :  { %v515_v48 = vrot.slane %v507_v43, %v2584_v44  ;;  %v522_v51 = vrot.slane %v508_v47, %v2584_v44  ;;  %v554_v47 = vld [vmem:[#allocation2 + $0x2] ss:$8 sm:$0xf] }
 0x220   :  { %v523_v56 = vcombine.low %v515_v48, %v522_v51 }
 0x222   :  { %v530_v57 = vrot.slane %v523_v56, %v2584_v44 }
 0x224   :  { %v532_v60 = vadd.f32 %v530_v57, %v360_v58 }
 0x226   :  { %v1743_v61 = vmul.f32 -1.442695, %v532_v60  ;;  %v540_v0 = vrot.slane %v532_v60, 3 }
 0x228   :  { %2278 = vpow2.f32 %v1743_v61 }
 0x232   :  { %v2279_v62 = vpop.eup %2278 }
 0x233   :  { %v536_v63 = vadd.f32 1.0, %v2279_v62 }
 0x235   :  { %2280 = vrcp.f32 %v536_v63 }
 0x236   :  { %2282 = vtanh.f32 %v540_v0 }
 0x23f   :  { %v2281_v5 = vpop.eup %2280 }
 0x240   :  { %v544_v7 = vrot.slane %v2281_v5, 1  ;;  %v2283_v8 = vpop.eup %2282  ;;  %v550_v14 = vrot.slane %v2281_v5, 2 }
 0x241   :  { %v547_v52 = vmul.f32 %v2283_v8, %v2281_v5 }
 0x242   :  { %v546_v12 = vmul.f32 %v544_v7, %v2589_v25 }
 0x244   :  { %v2630_v13 = vadd.f32 %v547_v52, %v546_v12 }
 0x246   :  { %2284 = vtanh.f32 %v2630_v13 }
 0x250   :  { %v2285_v16 = vpop.eup %2284 }
 0x251   :  { %v552_v17 = vmul.f32 %v2285_v16, %v550_v14 }
 0x253   :  { %620 = vmatmul.mubr.f32.vlgmr.msra.gmra.mrb[4].mxu0 %v552_v17  ;;  %691 = vmatmul.mubr.f32.vlgmr.msra.gmra.mrb[4].mxu1 %v552_v17 }
 0x254   :  { %1945 = vmatpush1.bf16.msra.mxu0 %v2445_v11  ;;  %1977 = vmatpush1.bf16.msra.mxu1 %v2448_v15 }
 0x255   :  { %1947 = vmatprep.subr.bf16.mxu0 %v2452_v19  ;;  %1979 = vmatprep.subr.bf16.mxu1 %v2454_v20 }
 0x256   :  { %813 = vmatprep.mubr.f32.mxu0 %v2385_v1  ;;  %884 = vmatprep.mubr.f32.mxu1 %v2385_v1 }
 0x258   :  { %1949 = vmatpush1.bf16.msra.mxu0 %v2457_v24  ;;  %1981 = vmatpush1.bf16.msra.mxu1 %v2461_v28 }
 0x259   :  { %1951 = vmatprep.subr.bf16.mxu0 %v2463_v29  ;;  %1983 = vmatprep.subr.bf16.mxu1 %v2465_v33 }
 0x25c   :  { %1953 = vmatpush1.bf16.msra.mxu0 %v2468_v37  ;;  %1985 = vmatpush1.bf16.msra.mxu1 %v2472_v41 }
 0x25d   :  { %1955 = vmatprep.subr.bf16.mxu0 %v2474_v42  ;;  %1987 = vmatprep.subr.bf16.mxu1 %v2477_v46 }
 0x260   :  { %1957 = vmatpush1.bf16.msra.mxu0 %v2480_v53  ;;  %1989 = vmatpush1.bf16.msra.mxu1 %v2484_v54 }
 0x261   :  { %1959 = vmatprep.subr.bf16.mxu0 %v2486_v55  ;;  %1991 = vmatprep.subr.bf16.mxu1 %v2489_v59 }
 0x264   :  { %1961 = vmatpush1.bf16.msra.mxu0 %v2492_v2  ;;  %1993 = vmatpush1.bf16.msra.mxu1 %v2496_v3 }
 0x265   :  { %1963 = vmatprep.subr.bf16.mxu0 %v2498_v4  ;;  %1995 = vmatprep.subr.bf16.mxu1 %v2501_v9 }
 0x268   :  { %1965 = vmatpush1.bf16.msra.mxu0 %v2504_v18  ;;  %1997 = vmatpush1.bf16.msra.mxu1 %v2508_v22 }
 0x269   :  { %1967 = vmatprep.subr.bf16.mxu0 %v2510_v23  ;;  %1999 = vmatprep.subr.bf16.mxu1 %v2516_v30 }
 0x26c   :  { %1969 = vmatpush1.bf16.msra.mxu0 %v2519_v38  ;;  %2001 = vmatpush1.bf16.msra.mxu1 %v2523_v39 }
 0x26d   :  { %1971 = vmatprep.subr.bf16.mxu0 %v2525_v40  ;;  %2003 = vmatprep.subr.bf16.mxu1 %v2528_v45 }
 0x270   :  { %1973 = vmatpush1.bf16.msra.mxu0 %v2531_v49  ;;  %2005 = vmatpush1.bf16.msra.mxu1 %v2535_v50 }
 0x271   :  { %2007 = vmatprep.subr.bf16.mxu0 %v2441_v6  ;;  %2039 = vmatprep.subr.bf16.mxu1 %v2443_v10 }
 0x326   :  { %v621_v21 = vpop.f32.mrb[4].mxu0  ;;  %v692_v25 = vpop.f32.mrb[4].mxu1 }
 0x327   :  { %v623_v26 = vpop.f32.mrb[5].mxu0  ;;  %v694_v27 = vpop.f32.mrb[5].mxu1 }
 0x328   :  { %v701_v31 = vcombine.low %v621_v21, %v623_v26  ;;  %v702_v32 = vcombine.low %v692_v25, %v694_v27 }
 0x32a   :  { %v709_v34 = vrot.slane %v701_v31, %v2584_v44  ;;  %v716_v35 = vrot.slane %v702_v32, %v2584_v44  ;;  %v748_v32 = vld [vmem:[#allocation2 + $0x3] ss:$8 sm:$0xf] }
 0x32c   :  { %v717_v36 = vcombine.low %v709_v34, %v716_v35 }
 0x32e   :  { %v724_v43 = vrot.slane %v717_v36, %v2584_v44 }
 0x330   :  { %v726_v48 = vadd.f32 %v724_v43, %v554_v47 }
 0x332   :  { %v1744_v51 = vmul.f32 -1.442695, %v726_v48  ;;  %v734_v58 = vrot.slane %v726_v48, 3 }
 0x334   :  { %2286 = vpow2.f32 %v1744_v51 }
 0x33e   :  { %v2287_v56 = vpop.eup %2286 }
 0x33f   :  { %v730_v57 = vadd.f32 1.0, %v2287_v56 }
 0x341   :  { %2288 = vrcp.f32 %v730_v57 }
 0x342   :  { %2290 = vtanh.f32 %v734_v58 }
 0x34b   :  { %v2289_v60 = vpop.eup %2288 }
 0x34c   :  { %v738_v61 = vrot.slane %v2289_v60, 1  ;;  %v2291_v62 = vpop.eup %2290  ;;  %v744_v7 = vrot.slane %v2289_v60, 2 }
 0x34d   :  { %v741_v63 = vmul.f32 %v2291_v62, %v2289_v60 }
 0x34e   :  { %v740_v0 = vmul.f32 %v738_v61, %v2630_v13 }
 0x350   :  { %v2671_v5 = vadd.f32 %v741_v63, %v740_v0 }
 0x352   :  { %2292 = vtanh.f32 %v2671_v5 }
 0x35c   :  { %v2293_v8 = vpop.eup %2292 }
 0x35d   :  { %v746_v52 = vmul.f32 %v2293_v8, %v744_v7 }
 0x35f   :  { %814 = vmatmul.mubr.f32.vlgmr.msra.gmra.mrb[6].mxu0 %v746_v52  ;;  %885 = vmatmul.mubr.f32.vlgmr.msra.gmra.mrb[6].mxu1 %v746_v52 }
 0x360   :  { %2009 = vmatpush1.bf16.msra.mxu0 %v2445_v11  ;;  %2041 = vmatpush1.bf16.msra.mxu1 %v2448_v15 }
 0x361   :  { %2011 = vmatprep.subr.bf16.mxu0 %v2452_v19  ;;  %2043 = vmatprep.subr.bf16.mxu1 %v2454_v20 }
 0x362   :  { %1007 = vmatprep.mubr.f32.mxu0 %v2385_v1  ;;  %1078 = vmatprep.mubr.f32.mxu1 %v2385_v1 }
 0x364   :  { %2013 = vmatpush1.bf16.msra.mxu0 %v2457_v24  ;;  %2045 = vmatpush1.bf16.msra.mxu1 %v2461_v28 }
 0x365   :  { %2015 = vmatprep.subr.bf16.mxu0 %v2463_v29  ;;  %2047 = vmatprep.subr.bf16.mxu1 %v2465_v33 }
 0x368   :  { %2017 = vmatpush1.bf16.msra.mxu0 %v2468_v37  ;;  %2049 = vmatpush1.bf16.msra.mxu1 %v2472_v41 }
 0x369   :  { %2019 = vmatprep.subr.bf16.mxu0 %v2474_v42  ;;  %2051 = vmatprep.subr.bf16.mxu1 %v2477_v46 }
 0x36c   :  { %2021 = vmatpush1.bf16.msra.mxu0 %v2480_v53  ;;  %2053 = vmatpush1.bf16.msra.mxu1 %v2484_v54 }
 0x36d   :  { %2023 = vmatprep.subr.bf16.mxu0 %v2486_v55  ;;  %2055 = vmatprep.subr.bf16.mxu1 %v2489_v59 }
 0x370   :  { %2025 = vmatpush1.bf16.msra.mxu0 %v2492_v2  ;;  %2057 = vmatpush1.bf16.msra.mxu1 %v2496_v3 }
 0x371   :  { %2027 = vmatprep.subr.bf16.mxu0 %v2498_v4  ;;  %2059 = vmatprep.subr.bf16.mxu1 %v2501_v9 }
 0x374   :  { %2029 = vmatpush1.bf16.msra.mxu0 %v2504_v18  ;;  %2061 = vmatpush1.bf16.msra.mxu1 %v2508_v22 }
 0x375   :  { %2031 = vmatprep.subr.bf16.mxu0 %v2510_v23  ;;  %2063 = vmatprep.subr.bf16.mxu1 %v2516_v30 }
 0x378   :  { %2033 = vmatpush1.bf16.msra.mxu0 %v2519_v38  ;;  %2065 = vmatpush1.bf16.msra.mxu1 %v2523_v39 }
 0x379   :  { %2035 = vmatprep.subr.bf16.mxu0 %v2525_v40  ;;  %2067 = vmatprep.subr.bf16.mxu1 %v2528_v45 }
 0x37c   :  { %2037 = vmatpush1.bf16.msra.mxu0 %v2531_v49  ;;  %2069 = vmatpush1.bf16.msra.mxu1 %v2535_v50 }
 0x37d   :  { %2071 = vmatprep.subr.bf16.mxu0 %v2441_v6  ;;  %2103 = vmatprep.subr.bf16.mxu1 %v2443_v10 }
 0x432   :  { %v815_v12 = vpop.f32.mrb[6].mxu0  ;;  %v886_v13 = vpop.f32.mrb[6].mxu1 }
 0x433   :  { %v817_v14 = vpop.f32.mrb[7].mxu0  ;;  %v888_v16 = vpop.f32.mrb[7].mxu1 }
 0x434   :  { %v895_v17 = vcombine.low %v815_v12, %v817_v14  ;;  %v896_v21 = vcombine.low %v886_v13, %v888_v16 }
 0x436   :  { %v903_v25 = vrot.slane %v895_v17, %v2584_v44  ;;  %v910_v26 = vrot.slane %v896_v21, %v2584_v44  ;;  %v942_v21 = vld [vmem:[#allocation2 + $0x4] ss:$8 sm:$0xf] }
 0x438   :  { %v911_v27 = vcombine.low %v903_v25, %v910_v26 }
 0x43a   :  { %v918_v31 = vrot.slane %v911_v27, %v2584_v44 }
 0x43c   :  { %v920_v34 = vadd.f32 %v918_v31, %v748_v32 }
 0x43e   :  { %v1745_v35 = vmul.f32 -1.442695, %v920_v34  ;;  %v928_v47 = vrot.slane %v920_v34, 3 }
 0x440   :  { %2294 = vpow2.f32 %v1745_v35 }
 0x44a   :  { %v2295_v36 = vpop.eup %2294 }
 0x44b   :  { %v924_v43 = vadd.f32 1.0, %v2295_v36 }
 0x44d   :  { %2296 = vrcp.f32 %v924_v43 }
 0x44e   :  { %2298 = vtanh.f32 %v928_v47 }
 0x457   :  { %v2297_v48 = vpop.eup %2296 }
 0x458   :  { %v932_v51 = vrot.slane %v2297_v48, 1  ;;  %v2299_v56 = vpop.eup %2298  ;;  %v938_v61 = vrot.slane %v2297_v48, 2 }
 0x459   :  { %v935_v57 = vmul.f32 %v2299_v56, %v2297_v48 }
 0x45a   :  { %v934_v58 = vmul.f32 %v932_v51, %v2671_v5 }
 0x45c   :  { %v2712_v60 = vadd.f32 %v935_v57, %v934_v58 }
 0x45e   :  { %2300 = vtanh.f32 %v2712_v60 }
 0x468   :  { %v2301_v62 = vpop.eup %2300 }
 0x469   :  { %v940_v63 = vmul.f32 %v2301_v62, %v938_v61 }
 0x46b   :  { %1008 = vmatmul.mubr.f32.vlgmr.msra.gmra.mrb[8].mxu0 %v940_v63  ;;  %1079 = vmatmul.mubr.f32.vlgmr.msra.gmra.mrb[8].mxu1 %v940_v63 }
 0x46c   :  { %2073 = vmatpush1.bf16.msra.mxu0 %v2445_v11  ;;  %2105 = vmatpush1.bf16.msra.mxu1 %v2448_v15 }
 0x46d   :  { %2075 = vmatprep.subr.bf16.mxu0 %v2452_v19  ;;  %2107 = vmatprep.subr.bf16.mxu1 %v2454_v20 }
 0x46e   :  { %1201 = vmatprep.mubr.f32.mxu0 %v2385_v1  ;;  %1272 = vmatprep.mubr.f32.mxu1 %v2385_v1 }
 0x470   :  { %2077 = vmatpush1.bf16.msra.mxu0 %v2457_v24  ;;  %2109 = vmatpush1.bf16.msra.mxu1 %v2461_v28 }
 0x471   :  { %2079 = vmatprep.subr.bf16.mxu0 %v2463_v29  ;;  %2111 = vmatprep.subr.bf16.mxu1 %v2465_v33 }
 0x474   :  { %2081 = vmatpush1.bf16.msra.mxu0 %v2468_v37  ;;  %2113 = vmatpush1.bf16.msra.mxu1 %v2472_v41 }
 0x475   :  { %2083 = vmatprep.subr.bf16.mxu0 %v2474_v42  ;;  %2115 = vmatprep.subr.bf16.mxu1 %v2477_v46 }
 0x478   :  { %2085 = vmatpush1.bf16.msra.mxu0 %v2480_v53  ;;  %2117 = vmatpush1.bf16.msra.mxu1 %v2484_v54 }
 0x479   :  { %2087 = vmatprep.subr.bf16.mxu0 %v2486_v55  ;;  %2119 = vmatprep.subr.bf16.mxu1 %v2489_v59 }
 0x47c   :  { %2089 = vmatpush1.bf16.msra.mxu0 %v2492_v2  ;;  %2121 = vmatpush1.bf16.msra.mxu1 %v2496_v3 }
 0x47d   :  { %2091 = vmatprep.subr.bf16.mxu0 %v2498_v4  ;;  %2123 = vmatprep.subr.bf16.mxu1 %v2501_v9 }
 0x480   :  { %2093 = vmatpush1.bf16.msra.mxu0 %v2504_v18  ;;  %2125 = vmatpush1.bf16.msra.mxu1 %v2508_v22 }
 0x481   :  { %2095 = vmatprep.subr.bf16.mxu0 %v2510_v23  ;;  %2127 = vmatprep.subr.bf16.mxu1 %v2516_v30 }
 0x484   :  { %2097 = vmatpush1.bf16.msra.mxu0 %v2519_v38  ;;  %2129 = vmatpush1.bf16.msra.mxu1 %v2523_v39 }
 0x485   :  { %2099 = vmatprep.subr.bf16.mxu0 %v2525_v40  ;;  %2131 = vmatprep.subr.bf16.mxu1 %v2528_v45 }
 0x488   :  { %2101 = vmatpush1.bf16.msra.mxu0 %v2531_v49  ;;  %2133 = vmatpush1.bf16.msra.mxu1 %v2535_v50 }
 0x489   :  { %2135 = vmatprep.subr.bf16.mxu0 %v2441_v6  ;;  %2167 = vmatprep.subr.bf16.mxu1 %v2443_v10 }
 0x53e   :  { %v1009_v0 = vpop.f32.mrb[8].mxu0  ;;  %v1080_v5 = vpop.f32.mrb[8].mxu1 }
 0x53f   :  { %v1011_v7 = vpop.f32.mrb[9].mxu0  ;;  %v1082_v8 = vpop.f32.mrb[9].mxu1 }
 0x540   :  { %v1089_v52 = vcombine.low %v1009_v0, %v1011_v7  ;;  %v1090_v12 = vcombine.low %v1080_v5, %v1082_v8 }
 0x542   :  { %v1097_v13 = vrot.slane %v1089_v52, %v2584_v44  ;;  %v1104_v14 = vrot.slane %v1090_v12, %v2584_v44  ;;  %v1136_v12 = vld [vmem:[#allocation2 + $0x5] ss:$8 sm:$0xf] }
 0x544   :  { %v1105_v16 = vcombine.low %v1097_v13, %v1104_v14 }
 0x546   :  { %v1112_v17 = vrot.slane %v1105_v16, %v2584_v44 }
 0x548   :  { %v1114_v25 = vadd.f32 %v1112_v17, %v942_v21 }
 0x54a   :  { %v1746_v26 = vmul.f32 -1.442695, %v1114_v25  ;;  %v1122_v32 = vrot.slane %v1114_v25, 3 }
 0x54c   :  { %2302 = vpow2.f32 %v1746_v26 }
 0x556   :  { %v2303_v27 = vpop.eup %2302 }
 0x557   :  { %v1118_v31 = vadd.f32 1.0, %v2303_v27 }
 0x559   :  { %2304 = vrcp.f32 %v1118_v31 }
 0x55a   :  { %2306 = vtanh.f32 %v1122_v32 }
 0x563   :  { %v2305_v34 = vpop.eup %2304 }
 0x564   :  { %v1126_v35 = vrot.slane %v2305_v34, 1  ;;  %v2307_v36 = vpop.eup %2306  ;;  %v1132_v51 = vrot.slane %v2305_v34, 2 }
 0x565   :  { %v1129_v43 = vmul.f32 %v2307_v36, %v2305_v34 }
 0x566   :  { %v1128_v47 = vmul.f32 %v1126_v35, %v2712_v60 }
 0x568   :  { %v2753_v48 = vadd.f32 %v1129_v43, %v1128_v47 }
 0x56a   :  { %2308 = vtanh.f32 %v2753_v48 }
 0x574   :  { %v2309_v56 = vpop.eup %2308 }
 0x575   :  { %v1134_v57 = vmul.f32 %v2309_v56, %v1132_v51  ;;  %v1524_v51 = vld [vmem:[#allocation2 + $0x7] ss:$8 sm:$0xf] }
 0x577   :  { %1202 = vmatmul.mubr.f32.vlgmr.msra.gmra.mrb[10].mxu0 %v1134_v57  ;;  %1273 = vmatmul.mubr.f32.vlgmr.msra.gmra.mrb[10].mxu1 %v1134_v57 }
 0x578   :  { %2137 = vmatpush1.bf16.msra.mxu0 %v2445_v11  ;;  %2169 = vmatpush1.bf16.msra.mxu1 %v2448_v15 }
 0x579   :  { %2139 = vmatprep.subr.bf16.mxu0 %v2452_v19  ;;  %2171 = vmatprep.subr.bf16.mxu1 %v2454_v20 }
 0x57a   :  { %1395 = vmatprep.mubr.f32.mxu0 %v2385_v1  ;;  %1466 = vmatprep.mubr.f32.mxu1 %v2385_v1 }
 0x57c   :  { %2141 = vmatpush1.bf16.msra.mxu0 %v2457_v24  ;;  %2173 = vmatpush1.bf16.msra.mxu1 %v2461_v28 }
 0x57d   :  { %2143 = vmatprep.subr.bf16.mxu0 %v2463_v29  ;;  %2175 = vmatprep.subr.bf16.mxu1 %v2465_v33 }
 0x580   :  { %2145 = vmatpush1.bf16.msra.mxu0 %v2468_v37  ;;  %2177 = vmatpush1.bf16.msra.mxu1 %v2472_v41 }
 0x581   :  { %2147 = vmatprep.subr.bf16.mxu0 %v2474_v42  ;;  %2179 = vmatprep.subr.bf16.mxu1 %v2477_v46 }
 0x584   :  { %2149 = vmatpush1.bf16.msra.mxu0 %v2480_v53  ;;  %2181 = vmatpush1.bf16.msra.mxu1 %v2484_v54 }
 0x585   :  { %2151 = vmatprep.subr.bf16.mxu0 %v2486_v55  ;;  %2183 = vmatprep.subr.bf16.mxu1 %v2489_v59 }
 0x588   :  { %2153 = vmatpush1.bf16.msra.mxu0 %v2492_v2  ;;  %2185 = vmatpush1.bf16.msra.mxu1 %v2496_v3 }
 0x589   :  { %2155 = vmatprep.subr.bf16.mxu0 %v2498_v4  ;;  %2187 = vmatprep.subr.bf16.mxu1 %v2501_v9 }
 0x58c   :  { %2157 = vmatpush1.bf16.msra.mxu0 %v2504_v18  ;;  %2189 = vmatpush1.bf16.msra.mxu1 %v2508_v22 }
 0x58d   :  { %2159 = vmatprep.subr.bf16.mxu0 %v2510_v23  ;;  %2191 = vmatprep.subr.bf16.mxu1 %v2516_v30 }
 0x590   :  { %2161 = vmatpush1.bf16.msra.mxu0 %v2519_v38  ;;  %2193 = vmatpush1.bf16.msra.mxu1 %v2523_v39 }
 0x591   :  { %2163 = vmatprep.subr.bf16.mxu0 %v2525_v40  ;;  %2195 = vmatprep.subr.bf16.mxu1 %v2528_v45 }
 0x594   :  { %2165 = vmatpush1.bf16.msra.mxu0 %v2531_v49  ;;  %2197 = vmatpush1.bf16.msra.mxu1 %v2535_v50 }
 0x595   :  { %2199 = vmatprep.subr.bf16.mxu0 %v2441_v6  ;;  %2231 = vmatprep.subr.bf16.mxu1 %v2443_v10 }
 0x64a   :  { %v1203_v58 = vpop.f32.mrb[10].mxu0  ;;  %v1274_v60 = vpop.f32.mrb[10].mxu1 }
 0x64b   :  { %v1205_v61 = vpop.f32.mrb[11].mxu0  ;;  %v1276_v62 = vpop.f32.mrb[11].mxu1 }
 0x64c   :  { %v1283_v63 = vcombine.low %v1203_v58, %v1205_v61  ;;  %v1284_v0 = vcombine.low %v1274_v60, %v1276_v62 }
 0x64e   :  { %v1291_v5 = vrot.slane %v1283_v63, %v2584_v44  ;;  %v1298_v7 = vrot.slane %v1284_v0, %v2584_v44 }
 0x650   :  { %v1299_v8 = vcombine.low %v1291_v5, %v1298_v7 }
 0x652   :  { %v1306_v52 = vrot.slane %v1299_v8, %v2584_v44 }
 0x654   :  { %v1308_v13 = vadd.f32 %v1306_v52, %v1136_v12 }
 0x656   :  { %v1747_v14 = vmul.f32 -1.442695, %v1308_v13  ;;  %v1316_v10 = vrot.slane %v1308_v13, 3 }
 0x658   :  { %2310 = vpow2.f32 %v1747_v14 }
 0x662   :  { %v2311_v6 = vpop.eup %2310 }
 0x663   :  { %v1312_v16 = vadd.f32 1.0, %v2311_v6 }
 0x665   :  { %2312 = vrcp.f32 %v1312_v16  ;;  %v1723_v16 = vld [vmem:[#allocation3] sm:$0x1] }
 0x666   :  { %2314 = vtanh.f32 %v1316_v10 }
 0x66f   :  { %v2313_v17 = vpop.eup %2312 }
 0x670   :  { %v1320_v21 = vrot.slane %v2313_v17, 1  ;;  %v2315_v25 = vpop.eup %2314  ;;  %v1326_v32 = vrot.slane %v2313_v17, 2 }
 0x671   :  { %v1323_v26 = vmul.f32 %v2315_v25, %v2313_v17 }
 0x672   :  { %v1322_v27 = vmul.f32 %v1320_v21, %v2753_v48 }
 0x674   :  { %v1324_v31 = vadd.f32 %v1323_v26, %v1322_v27 }
 0x676   :  { %2316 = vtanh.f32 %v1324_v31 }
 0x680   :  { %v2317_v34 = vpop.eup %2316 }
 0x681   :  { %v1328_v35 = vmul.f32 %v2317_v34, %v1326_v32 }
 0x683   :  { %1396 = vmatmul.mubr.f32.vlgmr.msra.gmra.mrb[12].mxu0 %v1328_v35  ;;  %1467 = vmatmul.mubr.f32.vlgmr.msra.gmra.mrb[12].mxu1 %v1328_v35 }
 0x684   :  { %2201 = vmatpush1.bf16.msra.mxu0 %v2445_v11  ;;  %2233 = vmatpush1.bf16.msra.mxu1 %v2448_v15 }
 0x685   :  { %2203 = vmatprep.subr.bf16.mxu0 %v2452_v19  ;;  %2235 = vmatprep.subr.bf16.mxu1 %v2454_v20 }
 0x686   :  { %1589 = vmatprep.mubr.f32.mxu0 %v2385_v1  ;;  %1660 = vmatprep.mubr.f32.mxu1 %v2385_v1 }
 0x688   :  { %2205 = vmatpush1.bf16.msra.mxu0 %v2457_v24  ;;  %2237 = vmatpush1.bf16.msra.mxu1 %v2461_v28 }
 0x689   :  { %2207 = vmatprep.subr.bf16.mxu0 %v2463_v29  ;;  %2239 = vmatprep.subr.bf16.mxu1 %v2465_v33 }
 0x68c   :  { %2209 = vmatpush1.bf16.msra.mxu0 %v2468_v37  ;;  %2241 = vmatpush1.bf16.msra.mxu1 %v2472_v41  ;;  %v1330_v41 = vld [vmem:[#allocation2 + $0x6] ss:$8 sm:$0xf] }
 0x68d   :  { %2211 = vmatprep.subr.bf16.mxu0 %v2474_v42  ;;  %2243 = vmatprep.subr.bf16.mxu1 %v2477_v46 }
 0x690   :  { %2213 = vmatpush1.bf16.msra.mxu0 %v2480_v53  ;;  %2245 = vmatpush1.bf16.msra.mxu1 %v2484_v54 }
 0x691   :  { %2215 = vmatprep.subr.bf16.mxu0 %v2486_v55  ;;  %2247 = vmatprep.subr.bf16.mxu1 %v2489_v59 }
 0x694   :  { %2217 = vmatpush1.bf16.msra.mxu0 %v2492_v2  ;;  %2249 = vmatpush1.bf16.msra.mxu1 %v2496_v3 }
 0x695   :  { %2219 = vmatprep.subr.bf16.mxu0 %v2498_v4  ;;  %2251 = vmatprep.subr.bf16.mxu1 %v2501_v9 }
 0x698   :  { %2221 = vmatpush1.bf16.msra.mxu0 %v2504_v18  ;;  %2253 = vmatpush1.bf16.msra.mxu1 %v2508_v22 }
 0x699   :  { %2223 = vmatprep.subr.bf16.mxu0 %v2510_v23  ;;  %2255 = vmatprep.subr.bf16.mxu1 %v2516_v30 }
 0x69c   :  { %2225 = vmatpush1.bf16.msra.mxu0 %v2519_v38  ;;  %2257 = vmatpush1.bf16.msra.mxu1 %v2523_v39 }
 0x69d   :  { %2227 = vmatprep.subr.bf16.mxu0 %v2525_v40  ;;  %2259 = vmatprep.subr.bf16.mxu1 %v2528_v45 }
 0x6a0   :  { %2229 = vmatpush1.bf16.msra.mxu0 %v2531_v49  ;;  %2261 = vmatpush1.bf16.msra.mxu1 %v2535_v50 }
 0x756   :  { %v1397_v1 = vpop.f32.mrb[12].mxu0  ;;  %v1468_v11 = vpop.f32.mrb[12].mxu1 }
 0x757   :  { %v1399_v15 = vpop.f32.mrb[13].mxu0  ;;  %v1470_v19 = vpop.f32.mrb[13].mxu1 }
 0x758   :  { %v1477_v20 = vcombine.low %v1397_v1, %v1399_v15  ;;  %v1478_v24 = vcombine.low %v1468_v11, %v1470_v19 }
 0x75a   :  { %v1485_v28 = vrot.slane %v1477_v20, %v2584_v44  ;;  %v1492_v29 = vrot.slane %v1478_v24, %v2584_v44 }
 0x75c   :  { %v1493_v33 = vcombine.low %v1485_v28, %v1492_v29 }
 0x75e   :  { %v1500_v37 = vrot.slane %v1493_v33, %v2584_v44 }
 0x760   :  { %v1502_v42 = vadd.f32 %v1500_v37, %v1330_v41 }
 0x762   :  { %v1748_v46 = vmul.f32 -1.442695, %v1502_v42  ;;  %v1510_v55 = vrot.slane %v1502_v42, 3 }
 0x764   :  { %2318 = vpow2.f32 %v1748_v46 }
 0x76e   :  { %v2319_v53 = vpop.eup %2318 }
 0x76f   :  { %v1506_v54 = vadd.f32 1.0, %v2319_v53 }
 0x771   :  { %2320 = vrcp.f32 %v1506_v54 }
 0x772   :  { %2322 = vtanh.f32 %v1510_v55 }
 0x77b   :  { %v2321_v59 = vpop.eup %2320 }
 0x77c   :  { %v1514_v2 = vrot.slane %v2321_v59, 1  ;;  %v2323_v3 = vpop.eup %2322  ;;  %v1520_v22 = vrot.slane %v2321_v59, 2 }
 0x77d   :  { %v1517_v4 = vmul.f32 %v2323_v3, %v2321_v59 }
 0x77e   :  { %v1516_v9 = vmul.f32 %v1514_v2, %v1324_v31 }
 0x780   :  { %v1518_v18 = vadd.f32 %v1517_v4, %v1516_v9 }
 0x782   :  { %2324 = vtanh.f32 %v1518_v18 }
 0x78c   :  { %v2325_v23 = vpop.eup %2324 }
 0x78d   :  { %v1522_v30 = vmul.f32 %v2325_v23, %v1520_v22 }
 0x78f   :  { %1590 = vmatmul.mubr.f32.vlgmr.msra.gmra.mrb[14].mxu0 %v1522_v30  ;;  %1661 = vmatmul.mubr.f32.vlgmr.msra.gmra.mrb[14].mxu1 %v1522_v30 }
 0x862   :  { %v1591_v38 = vpop.f32.mrb[14].mxu0  ;;  %v1662_v39 = vpop.f32.mrb[14].mxu1 }
 0x863   :  { %v1593_v40 = vpop.f32.mrb[15].mxu0  ;;  %v1664_v45 = vpop.f32.mrb[15].mxu1 }
 0x864   :  { %v1671_v49 = vcombine.low %v1591_v38, %v1593_v40  ;;  %v1672_v50 = vcombine.low %v1662_v39, %v1664_v45 }
 0x866   :  { %v1679_v36 = vrot.slane %v1671_v49, %v2584_v44  ;;  %v1686_v43 = vrot.slane %v1672_v50, %v2584_v44 }
 0x868   :  { %v1687_v47 = vcombine.low %v1679_v36, %v1686_v43 }
 0x86a   :  { %v1694_v48 = vrot.slane %v1687_v47, %v2584_v44  ;;  %v1717_v44 = vld [vmem:[%s2851_s4] sm:$0x1] }
 0x86c   :  { %v1696_v56 = vadd.f32 %v1694_v48, %v1524_v51 }
 0x86e   :  { %v1749_v57 = vmul.f32 -1.442695, %v1696_v56  ;;  %v1704_v61 = vrot.slane %v1696_v56, 3 }
 0x870   :  { %2326 = vpow2.f32 %v1749_v57 }
 0x87a   :  { %v2327_v58 = vpop.eup %2326 }
 0x87b   :  { %v1700_v60 = vadd.f32 1.0, %v2327_v58 }
 0x87d   :  { %2328 = vrcp.f32 %v1700_v60 }
 0x87e   :  { %2330 = vtanh.f32 %v1704_v61 }
 0x887   :  { %v2329_v62 = vpop.eup %2328 }
 0x888   :  { %v1708_v63 = vrot.slane %v2329_v62, 1  ;;  %v2331_v0 = vpop.eup %2330  ;;  %v1714_v52 = vrot.slane %v2329_v62, 2 }
 0x889   :  { %v1711_v7 = vmul.f32 %v2331_v0, %v2329_v62 }
 0x88a   :  { %v1710_v5 = vmul.f32 %v1708_v63, %v1518_v18 }
 0x88c   :  { %v1712_v8 = vadd.f32 %v1711_v7, %v1710_v5 }
 0x88e   :  { %2332 = vtanh.f32 %v1712_v8 }
 0x898   :  { %v2333_v12 = vpop.eup %2332 }
 0x899   :  { %v1716_v13 = vmul.f32 %v2333_v12, %v1714_v52 }
 0x89b   :  { %v1718_v14 = vmul.f32 %v1717_v44, %v1716_v13 }
 0x89d   :  { %v1720_v6 = vsel %vm1719_vm0, %v1718_v14, 0.0 }
 0x89e   :  { %1721 = vadd.xlane.f32.xlu0 %v1720_v6 }
 0x92b   :  { %v1722_v10 = vpop.xlane.xlu0 %1721 }
 0x92c   :  { %v1724_v17 = vadd.f32 %v1723_v16, %v1722_v10 }
 0x92e   :  { %1726 = vst.msk [vmem:[#allocation7] sm:$0x1] %vm1725_vm1, %v1724_v17 }
 0x92f   :  { %2367 = shalt.err (!%p2364_p12)
}
 0x930   :  { %s2368_s21 = scalar_lea.hbm %s2853_s6, 16 }
 0x931   :  { %p2369_p13 = scmp.ne.s32.totalorder %s2853_s6, %s2368_s21  ;;  %p2372_p0 = scmp.lt.u32.totalorder %s2368_s21, %s2853_s6 }
 0x933   :  { %p2374_p1 = pnand %p2372_p0, %p2369_p13 }
 0x935   :  { %2377 = shalt.err (!%p2374_p1)
}
 0x936   :  { %1736 = dma.vmem_to_hbm [thread:$0]  %s1734_s17, 16, %s2853_s6, [#allocation6]  }
 0x937   :  { %2380 = dma.done.wait [#allocation6], 16  }
 0x938   :  { %2381 = vsyncadd [#allocation6], 4294967280 }
 0x939   :  { %1740 = vsyncpa [#allocation5], 1 }
 0x93a   :  { %1741 = vsyncpa [#allocation6], 1 }

</bundles_post_ra>
